<compile_context>
chip_gen: v6e
topology: v6e:2x2x1
jax: 0.10.0
libtpu: 0.0.40
codegen_flags: <defaults>
</compile_context>

<pallas_src>
import jax
import jax.numpy as jnp
import numpy as np
from jax import lax
from jax.experimental import pallas as pl
from jax.experimental.pallas import tpu as pltpu


# ----------------------------------------------------------------------------
# Synthetic configuration (mirrors args['layers_critic_<domain>'])
# ----------------------------------------------------------------------------
LAYERS_CRITIC = {
    1: dict(f_in=4, f_out=8, k=4, s=2, p=1, input=16),   # first: conv+bias+LeakyReLU
    2: dict(f_in=8, f_out=16, k=4, s=2, p=1),            # middle: conv(no bias)+IN+LeakyReLU
    3: dict(f_in=16, f_out=1, k=4, s=1, p=0),            # last: conv+bias (no sigmoid for WGAN)
}
GAN_MODE = "WGAN"        # WGAN -> InstanceNorm1d(affine=True) middle blocks, no Sigmoid at end
EPS = 1e-5               # PyTorch InstanceNorm1d default eps
MAX_BATCH_BLOCK = 2048   # rows per grid step; safe for v5e's 16 MiB default scoped VMEM.
                         # (On v6e/v7x this could be raised to 4096-8192 with vmem_limit_bytes.)

# TODO(synk): for gan_mode != 'WGAN' the PyTorch middle block uses BatchNorm1d with running
#             stats; that path is not implemented here (InstanceNorm behavior is used instead).


def _round_up(v, m):
    return ((v + m - 1) // m) * m


def _conv_out_len(L, k, s, p):
    return (L + 2 * p - k) // s + 1


# ----------------------------------------------------------------------------
# Static layer plan (flat feature sizes + slab row offsets)
# ----------------------------------------------------------------------------
def _build_plan(layers_cfg, gan_mode):
    keys = sorted(layers_cfg.keys())
    L = layers_cfg[keys[0]]["input"]
    plan = []
    w_rows = 0     # bf16 conv-matrix slab rows (indexed by d_in)
    aux_rows = 0   # f32 InstanceNorm block-averaging-matrix slab rows (indexed by d_out)
    vec_rows = 0   # f32 bias / gamma / beta row-vector slab rows
    d_max = 0
    for idx, key_i in enumerate(keys):
        cfg = layers_cfg[key_i]
        L_out = _conv_out_len(L, cfg["k"], cfg["s"], cfg["p"])
        d_in, d_out = L * cfg["f_in"], L_out * cfg["f_out"]
        d_max = max(d_max, d_in, d_out)
        first, last = idx == 0, idx == len(keys) - 1
        lp = dict(
            key=key_i, L_in=L, L_out=L_out, c_in=cfg["f_in"], c_out=cfg["f_out"],
            s=cfg["s"], p=cfg["p"], d_in=d_in, d_out=d_out, w_off=w_rows,
            has_bias=(first or last), has_norm=(not first and not last),
            act=("leaky" if not last else ("sigmoid" if gan_mode == "Vanilla" else "none")),
        )
        w_rows += _round_up(d_in, 16)            # bf16 sublane packing = 16
        if lp["has_bias"]:
            lp["bias_row"] = vec_rows
            vec_rows += 1
        else:
            lp["bias_row"] = None
        if lp["has_norm"]:
            lp["am_off"] = aux_rows
            aux_rows += _round_up(d_out, 8)
            lp["gamma_row"], lp["beta_row"] = vec_rows, vec_rows + 1
            vec_rows += 2
        else:
            lp["am_off"] = None
        plan.append(lp)
        L = L_out
    return plan, w_rows, max(aux_rows, 8), _round_up(max(vec_rows, 1), 8), d_max


# ----------------------------------------------------------------------------
# Wrapper-side parameter packing
# ----------------------------------------------------------------------------
def _toeplitz_cl(w, L_in, L_out, s, p):
    """PyTorch Conv1d weight (C_out, C_in, K) -> dense matrix T of shape
    (C_in*L_in, C_out*L_out) with (c, l)-major flattening on BOTH sides, so that
        y.reshape(N, C_out*L_out) = x.reshape(N, C_in*L_in) @ T
    (zero padding of width p included via the indicator)."""
    C_out, C_in, K = w.shape
    lo = jnp.arange(L_out)[:, None, None]
    li = jnp.arange(L_in)[None, :, None]
    kk = jnp.arange(K)[None, None, :]
    sel = (li == lo * s + kk - p).astype(w.dtype)           # (L_out, L_in, K)
    T = jnp.einsum("oik,dck->cido", sel, w)                 # (C_in, L_in, C_out, L_out)
    return T.reshape(C_in * L_in, C_out * L_out)


def _build_slabs(params, plan, w_rows, aux_rows, vec_rows, d_max):
    w_slab = jnp.zeros((w_rows, d_max), jnp.float32)        # conv matrices (bf16 at the end)
    aux_slab = jnp.zeros((aux_rows, d_max), jnp.float32)    # IN block-averaging matrices
    vec_slab = jnp.zeros((vec_rows, d_max), jnp.float32)    # bias / gamma / beta rows
    for lp in plan:
        i = lp["key"]
        T = _toeplitz_cl(params[f"w{i}"].astype(jnp.float32),
                         lp["L_in"], lp["L_out"], lp["s"], lp["p"])
        w_slab = w_slab.at[lp["w_off"]: lp["w_off"] + lp["d_in"], : lp["d_out"]].set(T)
        if lp["has_bias"]:
            row = jnp.repeat(params[f"b{i}"].astype(jnp.float32), lp["L_out"])
            vec_slab = vec_slab.at[lp["bias_row"], : lp["d_out"]].set(row)
        if lp["has_norm"]:
            # (d_out, d_out) block matrix: (h @ am)[:, j] == per-channel mean over length,
            # already broadcast back to every length position (review item 4a).
            am = jnp.kron(jnp.eye(lp["c_out"], dtype=jnp.float32),
                          jnp.full((lp["L_out"], lp["L_out"]), 1.0 / lp["L_out"], jnp.float32))
            aux_slab = aux_slab.at[lp["am_off"]: lp["am_off"] + lp["d_out"],
                                   : lp["d_out"]].set(am)
            g = jnp.repeat(params[f"g{i}"].astype(jnp.float32), lp["L_out"])
            b = jnp.repeat(params[f"beta{i}"].astype(jnp.float32), lp["L_out"])
            vec_slab = vec_slab.at[lp["gamma_row"], : lp["d_out"]].set(g)
            vec_slab = vec_slab.at[lp["beta_row"], : lp["d_out"]].set(b)
    return w_slab.astype(jnp.bfloat16), aux_slab, vec_slab


# ----------------------------------------------------------------------------
# The fused Pallas kernel: all layers, one batch-block per grid step
# ----------------------------------------------------------------------------
def _make_fused_kernel(plan, eps):
    def kernel(x_ref, w_ref, aux_ref, vec_ref, out_ref):
        # x_ref:   (B_blk, d_in0)    batch on sublanes, flat (c, l) features on lanes
        # w_ref:   (w_rows, d_max)   bf16 packed Toeplitz conv matrices
        # aux_ref: (aux_rows, d_max) f32 InstanceNorm block-averaging matrices
        # vec_ref: (vec_rows, d_max) f32 bias / gamma / beta row vectors
        # out_ref: (B_blk, d_out_last)
        h = x_ref[...].astype(jnp.float32)
        for lp in plan:
            w = w_ref[lp["w_off"]: lp["w_off"] + lp["d_in"], : lp["d_out"]]
            # bf16 x bf16 operands -> f32 accumulation on the MXU (review item 5).
            h = jnp.dot(h.astype(jnp.bfloat16), w, preferred_element_type=jnp.float32)
            if lp["bias_row"] is not None:
                h = h + vec_ref[lp["bias_row"]: lp["bias_row"] + 1, : lp["d_out"]]
            if lp["has_norm"]:
                # InstanceNorm1d(affine=True); statistics in f32.  mean / var come out of
                # the MXU already broadcast over length (no sublane concatenates).
                am = aux_ref[lp["am_off"]: lp["am_off"] + lp["d_out"], : lp["d_out"]]
                mu = jnp.dot(h, am, preferred_element_type=jnp.float32)
                diff = h - mu
                var = jnp.dot(diff * diff, am, preferred_element_type=jnp.float32)
                h = diff * lax.rsqrt(var + eps)
                h = (h * vec_ref[lp["gamma_row"]: lp["gamma_row"] + 1, : lp["d_out"]]
                     + vec_ref[lp["beta_row"]: lp["beta_row"] + 1, : lp["d_out"]])
            if lp["act"] == "leaky":
                h = jnp.where(h > 0, h, 0.2 * h)
            elif lp["act"] == "sigmoid":
                h = jax.nn.sigmoid(h)
        out_ref[...] = h.astype(out_ref.dtype)
    return kernel


# ----------------------------------------------------------------------------
# Full Discriminator_DCGAN forward (public interface stays NCL)
# ----------------------------------------------------------------------------
def discriminator_dcgan_forward(x_ncl, params, layers_cfg=LAYERS_CRITIC, gan_mode=GAN_MODE):
    plan, w_rows, aux_rows, vec_rows, d_max = _build_plan(layers_cfg, gan_mode)
    N, C0, L0 = x_ncl.shape
    assert C0 == plan[0]["c_in"] and L0 == plan[0]["L_in"], (x_ncl.shape, plan[0])
    d0 = plan[0]["d_in"]
    d_last, c_last, l_last = plan[-1]["d_out"], plan[-1]["c_out"], plan[-1]["L_out"]

    # (N, C, L) -> (N, C*L): contiguous reshape only; no HBM transpose and no batch padding.
    x_flat = x_ncl.astype(jnp.float32).reshape(N, d0)

    # Batch rows per grid step: as large as sensible (few-MiB working set), ragged final block.
    b_blk = min(MAX_BATCH_BLOCK, _round_up(N, 8))
    grid = (pl.cdiv(N, b_blk),)

    w_slab, aux_slab, vec_slab = _build_slabs(params, plan, w_rows, aux_rows, vec_rows, d_max)
    kernel = _make_fused_kernel(plan, EPS)

    out = pl.pallas_call(
        kernel,
        out_shape=jax.ShapeDtypeStruct((N, d_last), jnp.float32),
        grid=grid,
        in_specs=[
            pl.BlockSpec((b_blk, d0), lambda i: (i, 0)),        # batch block of inputs
            pl.BlockSpec(w_slab.shape, lambda i: (0, 0)),       # resident conv-weight slab
            pl.BlockSpec(aux_slab.shape, lambda i: (0, 0)),     # resident IN-matrix slab
            pl.BlockSpec(vec_slab.shape, lambda i: (0, 0)),     # resident vector slab
        ],
        out_specs=pl.BlockSpec((b_blk, d_last), lambda i: (i, 0)),
        # TODO(synk): on v7x, verify the "parallel" batch axis shards across both TensorCores
        #             (switch to pltpu.CORE_PARALLEL if one core is found idle in xprof).
        compiler_params=pltpu.CompilerParams(dimension_semantics=("parallel",)),
    )(x_flat, w_slab, aux_slab, vec_slab)

    # Columns are (c, l)-major, so a plain reshape already yields NCL: (N, C_last, L_last).
    return out.reshape(N, c_last, l_last)


# ----------------------------------------------------------------------------
# Pure-JAX reference (for correctness check)
# ----------------------------------------------------------------------------
def _conv1d_ref(x_ncl, w, b, s, p):
    out = lax.conv_general_dilated(
        x_ncl, w, window_strides=(s,), padding=[(p, p)],
        dimension_numbers=("NCH", "OIH", "NCH"))
    if b is not None:
        out = out + b[None, :, None]
    return out


def _instance_norm_ref(x_ncl, gamma, beta, eps=EPS):
    mean = jnp.mean(x_ncl, axis=-1, keepdims=True)
    var = jnp.mean((x_ncl - mean) ** 2, axis=-1, keepdims=True)
    y = (x_ncl - mean) * lax.rsqrt(var + eps)
    return y * gamma[None, :, None] + beta[None, :, None]


def discriminator_ref(x_ncl, params, layers_cfg=LAYERS_CRITIC, gan_mode=GAN_MODE):
    keys = sorted(layers_cfg.keys())
    n_layers = len(keys)
    cfg = layers_cfg[keys[0]]
    x = _conv1d_ref(x_ncl, params["w1"], params["b1"], cfg["s"], cfg["p"])
    x = jnp.where(x > 0, x, 0.2 * x)
    for i in keys[1:]:
        cfg = layers_cfg[i]
        if i < n_layers:
            x = _conv1d_ref(x, params[f"w{i}"], None, cfg["s"], cfg["p"])
            x = _instance_norm_ref(x, params[f"g{i}"], params[f"beta{i}"])
            x = jnp.where(x > 0, x, 0.2 * x)
        else:
            x = _conv1d_ref(x, params[f"w{i}"], params[f"b{i}"], cfg["s"], cfg["p"])
            if gan_mode == "Vanilla":
                x = jax.nn.sigmoid(x)
    return x


# ----------------------------------------------------------------------------
# Deterministic parameter init (N(0, 0.02) for conv & norm weights, like init_weights)
# ----------------------------------------------------------------------------
def init_params(key, layers_cfg=LAYERS_CRITIC):
    params = {}
    keys = sorted(layers_cfg.keys())
    n_layers = len(keys)
    for i in keys:
        cfg = layers_cfg[i]
        key, kw, kb, kg = jax.random.split(key, 4)
        params[f"w{i}"] = 0.02 * jax.random.normal(
            kw, (cfg["f_out"], cfg["f_in"], cfg["k"]), jnp.float32)
        if i == keys[0] or i == n_layers:
            params[f"b{i}"] = 0.02 * jax.random.normal(kb, (cfg["f_out"],), jnp.float32)
        else:
            params[f"g{i}"] = 0.02 * jax.random.normal(kg, (cfg["f_out"],), jnp.float32)
            params[f"beta{i}"] = jnp.zeros((cfg["f_out"],), jnp.float32)
    return params


if __name__ == "__main__":
    key = jax.random.PRNGKey(0)
    key, kx = jax.random.split(key)

    N = 2
    C_in = LAYERS_CRITIC[1]["f_in"]
    L = LAYERS_CRITIC[1]["input"]
    x = jax.random.normal(kx, (N, C_in, L), jnp.float32)     # NCL, like torch Conv1d input
    params = init_params(key)

    fwd = jax.jit(discriminator_dcgan_forward)
    out = jax.block_until_ready(fwd(x, params))
    ref = jax.block_until_ready(discriminator_ref(x, params))
    assert out.shape == ref.shape == (N, LAYERS_CRITIC[3]["f_out"], 1), out.shape
    np.testing.assert_allclose(np.asarray(out), np.asarray(ref), rtol=2e-3, atol=2e-3)

    # Larger batch: exercises the 2048-row blocks, the multi-step grid and the ragged final
    # block (no full-batch HBM padding).
    key, kx2 = jax.random.split(key)
    N2 = 2200
    x2 = jax.random.normal(kx2, (N2, C_in, L), jnp.float32)
    out2 = jax.block_until_ready(fwd(x2, params))
    ref2 = jax.block_until_ready(discriminator_ref(x2, params))
    np.testing.assert_allclose(np.asarray(out2), np.asarray(ref2), rtol=2e-3, atol=2e-3)

    print("KERNEL_OK")
</pallas_src>

<mosaic_0001>
module attributes {stable_mosaic.version = 11 : i64} {
  func.func @kernel(%arg0: i32, %arg1: memref<8x64xf32, #tpu.memory_space<vmem>>, %arg2: memref<192x64xbf16, #tpu.memory_space<vmem>>, %arg3: memref<64x64xf32, #tpu.memory_space<vmem>>, %arg4: memref<8x64xf32, #tpu.memory_space<vmem>>, %arg5: memref<8x1xf32, #tpu.memory_space<vmem>>) attributes {dimension_semantics = [#tpu.dimension_semantics<parallel>], iteration_bounds = array<i64: 1>, scalar_prefetch = 0 : i64, scratch_operands = 0 : i64, tpu.core_type = #tpu.core_type<tc>, window_params = [{transform_indices = @transform_0, window_bounds = array<i64: 8, 64>}, {pipeline_mode = #tpu.pipeline_mode<synchronous>, transform_indices = @transform_1, window_bounds = array<i64: 192, 64>}, {pipeline_mode = #tpu.pipeline_mode<synchronous>, transform_indices = @transform_2, window_bounds = array<i64: 64, 64>}, {pipeline_mode = #tpu.pipeline_mode<synchronous>, transform_indices = @transform_3, window_bounds = array<i64: 8, 64>}, {transform_indices = @transform_4, window_bounds = array<i64: 8, 1>}]} {
    %c0 = arith.constant 0 : index
    %c0_0 = arith.constant 0 : index
    %0 = vector.load %arg1[%c0, %c0_0] : memref<8x64xf32, #tpu.memory_space<vmem>>, vector<8x64xf32>
    %c0_1 = arith.constant 0 : index
    %c0_2 = arith.constant 0 : index
    %1 = vector.load %arg2[%c0_1, %c0_2] : memref<192x64xbf16, #tpu.memory_space<vmem>>, vector<64x64xbf16>
    %2 = arith.truncf %0 : vector<8x64xf32> to vector<8x64xbf16>
    %cst = arith.constant dense<0.000000e+00> : vector<8x64xf32>
    %3 = tpu.matmul %2, %1, %cst {dimension_numbers = #tpu.dot_dimension_numbers<[1], [0], [0], [1], [0, 0, 1, 1], [], []>} : vector<8x64xbf16>, vector<64x64xbf16>, vector<8x64xf32> -> vector<8x64xf32>
    %c0_3 = arith.constant 0 : index
    %c0_4 = arith.constant 0 : index
    %4 = vector.load %arg4[%c0_3, %c0_4] : memref<8x64xf32, #tpu.memory_space<vmem>>, vector<1x64xf32>
    %5 = vector.broadcast %4 : vector<1x64xf32> to vector<8x64xf32>
    %6 = arith.addf %3, %5 : vector<8x64xf32>
    %cst_5 = arith.constant 0.000000e+00 : f32
    %7 = vector.broadcast %cst_5 : f32 to vector<8x64xf32>
    %8 = arith.cmpf ogt, %6, %7 : vector<8x64xf32>
    %cst_6 = arith.constant 2.000000e-01 : f32
    %9 = vector.broadcast %cst_6 : f32 to vector<8x64xf32>
    %10 = arith.mulf %9, %6 : vector<8x64xf32>
    %11 = arith.select %8, %6, %10 : vector<8x64xi1>, vector<8x64xf32>
    %c64 = arith.constant 64 : index
    %c0_7 = arith.constant 0 : index
    %12 = vector.load %arg2[%c64, %c0_7] : memref<192x64xbf16, #tpu.memory_space<vmem>>, vector<64x64xbf16>
    %13 = arith.truncf %11 : vector<8x64xf32> to vector<8x64xbf16>
    %cst_8 = arith.constant dense<0.000000e+00> : vector<8x64xf32>
    %14 = tpu.matmul %13, %12, %cst_8 {dimension_numbers = #tpu.dot_dimension_numbers<[1], [0], [0], [1], [0, 0, 1, 1], [], []>} : vector<8x64xbf16>, vector<64x64xbf16>, vector<8x64xf32> -> vector<8x64xf32>
    %c0_9 = arith.constant 0 : index
    %c0_10 = arith.constant 0 : index
    %15 = vector.load %arg3[%c0_9, %c0_10] : memref<64x64xf32, #tpu.memory_space<vmem>>, vector<64x64xf32>
    %cst_11 = arith.constant dense<0.000000e+00> : vector<8x64xf32>
    %16 = tpu.matmul %14, %15, %cst_11 {dimension_numbers = #tpu.dot_dimension_numbers<[1], [0], [0], [1], [0, 0, 1, 1], [], []>} : vector<8x64xf32>, vector<64x64xf32>, vector<8x64xf32> -> vector<8x64xf32>
    %17 = arith.subf %14, %16 : vector<8x64xf32>
    %18 = arith.mulf %17, %17 : vector<8x64xf32>
    %cst_12 = arith.constant dense<0.000000e+00> : vector<8x64xf32>
    %19 = tpu.matmul %18, %15, %cst_12 {dimension_numbers = #tpu.dot_dimension_numbers<[1], [0], [0], [1], [0, 0, 1, 1], [], []>} : vector<8x64xf32>, vector<64x64xf32>, vector<8x64xf32> -> vector<8x64xf32>
    %cst_13 = arith.constant 9.99999974E-6 : f32
    %20 = vector.broadcast %cst_13 : f32 to vector<8x64xf32>
    %21 = arith.addf %19, %20 : vector<8x64xf32>
    %22 = math.rsqrt %21 : vector<8x64xf32>
    %23 = arith.mulf %17, %22 : vector<8x64xf32>
    %c1 = arith.constant 1 : index
    %c0_14 = arith.constant 0 : index
    %24 = vector.load %arg4[%c1, %c0_14] : memref<8x64xf32, #tpu.memory_space<vmem>>, vector<1x64xf32>
    %25 = vector.broadcast %24 : vector<1x64xf32> to vector<8x64xf32>
    %26 = arith.mulf %23, %25 : vector<8x64xf32>
    %c2 = arith.constant 2 : index
    %c0_15 = arith.constant 0 : index
    %27 = vector.load %arg4[%c2, %c0_15] : memref<8x64xf32, #tpu.memory_space<vmem>>, vector<1x64xf32>
    %28 = vector.broadcast %27 : vector<1x64xf32> to vector<8x64xf32>
    %29 = arith.addf %26, %28 : vector<8x64xf32>
    %cst_16 = arith.constant 0.000000e+00 : f32
    %30 = vector.broadcast %cst_16 : f32 to vector<8x64xf32>
    %31 = arith.cmpf ogt, %29, %30 : vector<8x64xf32>
    %cst_17 = arith.constant 2.000000e-01 : f32
    %32 = vector.broadcast %cst_17 : f32 to vector<8x64xf32>
    %33 = arith.mulf %32, %29 : vector<8x64xf32>
    %34 = arith.select %31, %29, %33 : vector<8x64xi1>, vector<8x64xf32>
    %c128 = arith.constant 128 : index
    %c0_18 = arith.constant 0 : index
    %35 = vector.load %arg2[%c128, %c0_18] : memref<192x64xbf16, #tpu.memory_space<vmem>>, vector<64x1xbf16>
    %36 = arith.truncf %34 : vector<8x64xf32> to vector<8x64xbf16>
    %cst_19 = arith.constant dense<0.000000e+00> : vector<8x1xf32>
    %37 = tpu.matmul %36, %35, %cst_19 {dimension_numbers = #tpu.dot_dimension_numbers<[1], [0], [0], [1], [0, 0, 1, 1], [], []>} : vector<8x64xbf16>, vector<64x1xbf16>, vector<8x1xf32> -> vector<8x1xf32>
    %c3 = arith.constant 3 : index
    %c0_20 = arith.constant 0 : index
    %38 = vector.load %arg4[%c3, %c0_20] : memref<8x64xf32, #tpu.memory_space<vmem>>, vector<1x1xf32>
    %39 = vector.broadcast %38 : vector<1x1xf32> to vector<8x1xf32>
    %40 = arith.addf %37, %39 : vector<8x1xf32>
    %c0_21 = arith.constant 0 : index
    %c0_22 = arith.constant 0 : index
    %41 = vector.load %arg5[%c0_21, %c0_22] : memref<8x1xf32, #tpu.memory_space<vmem>>, vector<8x1xf32>
    tpu.vector_store %arg5[%c0_21, %c0_22], %40 {strides = array<i32>} : memref<8x1xf32, #tpu.memory_space<vmem>>, vector<8x1xf32>,
    return
  }
  func.func @transform_0(%arg0: i32) -> (i32, i32) {
    %c0_i32 = arith.constant 0 : i32
    %c0_i32_0 = arith.constant 0 : i32
    return %arg0, %c0_i32 : i32, i32
  }
  func.func @transform_1(%arg0: i32) -> (i32, i32) {
    %c0_i32 = arith.constant 0 : i32
    %c0_i32_0 = arith.constant 0 : i32
    %c0_i32_1 = arith.constant 0 : i32
    return %c0_i32, %c0_i32_0 : i32, i32
  }
  func.func @transform_2(%arg0: i32) -> (i32, i32) {
    %c0_i32 = arith.constant 0 : i32
    %c0_i32_0 = arith.constant 0 : i32
    %c0_i32_1 = arith.constant 0 : i32
    return %c0_i32, %c0_i32_0 : i32, i32
  }
  func.func @transform_3(%arg0: i32) -> (i32, i32) {
    %c0_i32 = arith.constant 0 : i32
    %c0_i32_0 = arith.constant 0 : i32
    %c0_i32_1 = arith.constant 0 : i32
    return %c0_i32, %c0_i32_0 : i32, i32
  }
  func.func @transform_4(%arg0: i32) -> (i32, i32) {
    %c0_i32 = arith.constant 0 : i32
    %c0_i32_0 = arith.constant 0 : i32
    return %arg0, %c0_i32 : i32, i32
  }
}

</mosaic_0001>

<bundles_post_ra>
// kernel: discriminator_dcgan_forward.1
= control target key start
LH: loop header
LB: loop body
LE: loop exit
PB: predicated region body
PF: predicated region fallthrough
CT: control target
= control target key end

     0   :  { %v621_v1 = vmov 0.0   ;;  %vm622_vm0 = vmmov 0   ;;  %vm57_vm1 = vcmask 523264   ;;  %vm434_vm4 = vcmask 7168   ;;  %s769_s0 = inlined_call_operand.vmem [shape: f32[2,64], index: 0, kind: input, shape index: {}]   ;;  %s770_s1 = inlined_call_operand.vmem [shape: bf16[192,64], index: 1, kind: input, shape index: {}]   ;;  %s771_s2 = inlined_call_operand.vmem [shape: f32[64,64], index: 2, kind: input, shape index: {}]   ;;  %s772_s3 = inlined_call_operand.vmem [shape: f32[8,64], index: 3, kind: input, shape index: {}]   ;;  %s773_s4 = inlined_call_operand.vmem [shape: f32[2,1], index: 4, kind: output, shape index: {}]  }
   0x1   :  { %v607_v0 = vld [vmem:[%s770_s1 + $0x18] sm:$0xff]   ;;  %531 = vmatprep.subr.bf16.mxu1 %v621_v1  ;;  %555 = vmatprep.subr.mxu0 %v621_v1  ;;  %v608_v2 = vld [vmem:[%s770_s1 + $0x10] sm:$0xff]   ;;  %v609_v3 = vld [vmem:[%s770_s1 + $0x8] sm:$0xff]  }
   0x2   :  { %532 = vmatpush3.bf16.msra.mxu1 %v607_v0  ;;  %539 = vmatprep.mubr.msk.bf16.mxu1 %vm622_vm0, %v621_v1  ;;  %v610_v4 = vld [vmem:[%s770_s1] sm:$0xff]   ;;  %v611_v7 = vld [vmem:[%s770_s1 + $0x38] sm:$0xff]   ;;  %v612_v8 = vld [vmem:[%s770_s1 + $0x30] sm:$0xff]  }
   0x3   :  { %533 = vmatprep.subr.bf16.mxu1 %v621_v1  ;;  %571 = vmatprep.mubr.msk.f32.mxu0 %vm622_vm0, %v621_v1  ;;  %v18_v5 = vld [vmem:[%s769_s0] sm:$0xff]  ;;  %v613_v9 = vld [vmem:[%s770_s1 + $0x28] sm:$0xff]   ;;  %v187_v11 = vld [vmem:[%s771_s2 + $0x38] sm:$0xff] }
   0x4   :  { %v27_v6 = vpack.c.bf16 %v18_v5, %v18_v5  ;;  %v614_v10 = vld [vmem:[%s770_s1 + $0x20] sm:$0xff]   ;;  %v186_v12 = vld [vmem:[%s771_s2 + $0x30] sm:$0xff]  ;;  %556 = vmatpush3.msra.mxu0 %v187_v11  ;;  %v185_v13 = vld [vmem:[%s771_s2 + $0x28] sm:$0xff] }
   0x5   :  { %557 = vmatprep.subr.mxu0 %v621_v1  ;;  %v184_v14 = vld [vmem:[%s771_s2 + $0x20] sm:$0xff]  ;;  %v183_v15 = vld [vmem:[%s771_s2 + $0x18] sm:$0xff]  ;;  %v182_v16 = vld [vmem:[%s771_s2 + $0x10] sm:$0xff] }
   0x6   :  { %534 = vmatpush3.bf16.msra.mxu1 %v608_v2  ;;  %558 = vmatpush3.msra.mxu0 %v186_v12  ;;  %v181_v17 = vld [vmem:[%s771_s2 + $0x8] sm:$0xff]  ;;  %v477_v18 = vld [vmem:[%s772_s3] ss:$0 sm:$0xff]  ;;  %v615_v36 = vld [vmem:[%s770_s1 + $0x58] sm:$0xff]  }
   0x7   :  { %535 = vmatprep.subr.bf16.mxu1 %v621_v1  ;;  %559 = vmatprep.subr.mxu0 %v621_v1  ;;  %v180_v27 = vld [vmem:[%s771_s2] sm:$0xff]  ;;  %v616_v37 = vld [vmem:[%s770_s1 + $0x50] sm:$0xff]   ;;  %v617_v38 = vld [vmem:[%s770_s1 + $0x48] sm:$0xff]  }
   0x8   :  { %560 = vmatpush3.msra.mxu0 %v185_v13  ;;  %v618_v39 = vld [vmem:[%s770_s1 + $0x40] sm:$0xff]  }
   0x9   :  { %561 = vmatprep.subr.mxu0 %v621_v1  ;;  %v490_v44 = vld [vmem:[%s772_s3 + $0x1] ss:$0 sm:$0xff]  ;;  %v491_v46 = vld [vmem:[%s772_s3 + $0x2] ss:$0 sm:$0xff]  ;;  %v492_v52 = vld [vmem:[%s772_s3 + $0x3] ss:$0 sm:$0xff] }
   0xa   :  { %536 = vmatpush3.bf16.msra.mxu1 %v609_v3  ;;  %562 = vmatpush3.msra.mxu0 %v184_v14 }
   0xb   :  { %537 = vmatprep.subr.bf16.mxu1 %v621_v1  ;;  %563 = vmatprep.subr.mxu0 %v621_v1 }
   0xc   :  { %564 = vmatpush3.msra.mxu0 %v183_v15 }
   0xd   :  { %565 = vmatprep.subr.mxu0 %v621_v1 }
   0xe   :  { %538 = vmatpush3.bf16.msra.mxu1 %v610_v4  ;;  %566 = vmatpush3.msra.mxu0 %v182_v16 }
   0xf   :  { %543 = vmatprep.subr.bf16.mxu1 %v621_v1  ;;  %567 = vmatprep.subr.mxu0 %v621_v1 }
  0x10   :  { %568 = vmatpush3.msra.mxu0 %v181_v17 }
  0x11   :  { %540 = vmatmul.mubr.msk.bf16.vlgmr.msra.gmra.mxu1 %vm57_vm1, %v27_v6  ;;  %569 = vmatprep.subr.mxu0 %v621_v1 }
  0x12   :  { %544 = vmatpush3.bf16.msra.mxu1 %v611_v7  ;;  %551 = vmatprep.mubr.msk.bf16.mxu1 %vm622_vm0, %v621_v1 }
  0x13   :  { %545 = vmatprep.subr.bf16.mxu1 %v621_v1  ;;  %570 = vmatpush3.msra.mxu0 %v180_v27 }
  0x14   :  { %593 = vmatprep.subr.bf16.mxu0 %v621_v1 }
  0x16   :  { %546 = vmatpush3.bf16.msra.mxu1 %v612_v8 }
  0x17   :  { %547 = vmatprep.subr.bf16.mxu1 %v621_v1 }
  0x1a   :  { %548 = vmatpush3.bf16.msra.mxu1 %v613_v9 }
  0x1b   :  { %549 = vmatprep.subr.bf16.mxu1 %v621_v1 }
  0x1e   :  { %550 = vmatpush3.bf16.msra.mxu1 %v614_v10 }
  0x1f   :  { %574 = vmatprep.subr.mxu1 %v621_v1 }
  0xd1   :  { %v95_v19 = vpop.f32.mrf.mxu1 }
  0xd2   :  { %v96_v20 = vadd.f32 %v477_v18, %v95_v19 }
  0xd3   :  { %v541_v21 = vpop.f32.mrf.mxu1 }
  0xd4   :  { %vm101_vm2 = vcmp.gt.f32.partialorder %v96_v20, 0.0  ;;  %v102_v22 = vmul.f32 0.2, %v96_v20 }
  0xd5   :  { %v98_v23 = vpop.f32.mrf.mxu1 }
  0xd6   :  { %v103_v24 = vsel %vm101_vm2, %v96_v20, %v102_v22 }
  0xd7   :  { %v112_v25 = vpack.c.bf16 %v103_v24, %v103_v24  ;;  %v542_v26 = vpop.f32.mrf.mxu1 }
  0xd9   :  { %552 = vmatmul.mubr.msk.bf16.vlgmr.msra.gmra.mxu1 %vm57_vm1, %v112_v25 }
  0xda   :  { %575 = vmatpush3.msra.mxu1 %v187_v11  ;;  %590 = vmatprep.mubr.msk.f32.mxu1 %vm622_vm0, %v621_v1 }
  0xdb   :  { %576 = vmatprep.subr.mxu1 %v621_v1 }
  0xdc   :  { %577 = vmatpush3.msra.mxu1 %v186_v12 }
  0xdd   :  { %578 = vmatprep.subr.mxu1 %v621_v1 }
  0xde   :  { %579 = vmatpush3.msra.mxu1 %v185_v13 }
  0xdf   :  { %580 = vmatprep.subr.mxu1 %v621_v1 }
  0xe0   :  { %581 = vmatpush3.msra.mxu1 %v184_v14 }
  0xe1   :  { %582 = vmatprep.subr.mxu1 %v621_v1 }
  0xe2   :  { %583 = vmatpush3.msra.mxu1 %v183_v15 }
  0xe3   :  { %584 = vmatprep.subr.mxu1 %v621_v1 }
  0xe4   :  { %585 = vmatpush3.msra.mxu1 %v182_v16 }
  0xe5   :  { %586 = vmatprep.subr.mxu1 %v621_v1 }
  0xe6   :  { %587 = vmatpush3.msra.mxu1 %v181_v17 }
  0xe7   :  { %588 = vmatprep.subr.mxu1 %v621_v1 }
  0xe8   :  { %589 = vmatpush3.msra.mxu1 %v180_v27 }
 0x199   :  { %v174_v28 = vpop.f32.mrf.mxu1 }
 0x19a   :  { %572 = vmatmul.mubr.msk.f32.vlgmr.msra.gmra.mxu0 %vm57_vm1, %v174_v28 }
 0x19b   :  { %v553_v29 = vpop.f32.mrf.mxu1  ;;  %601 = vmatprep.mubr.msk.bf16.mxu0 %vm622_vm0, %v621_v1  ;;  %594 = vmatpush3.bf16.msra.mxu0 %v615_v36 }
 0x19c   :  { %595 = vmatprep.subr.bf16.mxu0 %v621_v1 }
 0x19d   :  { %v177_v30 = vpop.f32.mrf.mxu1 }
 0x19f   :  { %v554_v31 = vpop.f32.mrf.mxu1  ;;  %596 = vmatpush3.bf16.msra.mxu0 %v616_v37 }
 0x1a0   :  { %597 = vmatprep.subr.bf16.mxu0 %v621_v1 }
 0x1a3   :  { %598 = vmatpush3.bf16.msra.mxu0 %v617_v38 }
 0x1a4   :  { %599 = vmatprep.subr.bf16.mxu0 %v621_v1 }
 0x1a7   :  { %600 = vmatpush3.bf16.msra.mxu0 %v618_v39 }
 0x25a   :  { %v257_v32 = vpop.f32.mrf.mxu0 }
 0x25b   :  { %v261_v33 = vsub.f32 %v174_v28, %v257_v32 }
 0x25c   :  { %v573_v34 = vpop.f32.mrf.mxu0 }
 0x25d   :  { %v262_v35 = vmul.f32 %v261_v33, %v261_v33 }
 0x25f   :  { %591 = vmatmul.mubr.msk.f32.vlgmr.msra.gmra.mxu1 %vm57_vm1, %v262_v35 }
 0x31f   :  { %v332_v40 = vpop.f32.mrf.mxu1 }
 0x320   :  { %v333_v41 = vadd.f32 1e-05, %v332_v40 }
 0x321   :  { %v592_v42 = vpop.f32.mrf.mxu1 }
 0x322   :  { %619 = vrsqrt.f32 %v333_v41 }
 0x32f   :  { %v620_v43 = vpop.eup %619 }
 0x330   :  { %v337_v45 = vmul.f32 %v620_v43, %v261_v33 }
 0x332   :  { %v343_v47 = vmul.f32 %v490_v44, %v337_v45 }
 0x334   :  { %v349_v48 = vadd.f32 %v491_v46, %v343_v47 }
 0x336   :  { %vm350_vm3 = vcmp.gt.f32.partialorder %v349_v48, 0.0  ;;  %v351_v49 = vmul.f32 0.2, %v349_v48 }
 0x338   :  { %v352_v50 = vsel %vm350_vm3, %v349_v48, %v351_v49 }
 0x339   :  { %v361_v51 = vpack.c.bf16 %v352_v50, %v352_v50 }
 0x33b   :  { %602 = vmatmul.mubr.msk.bf16.vlgmr.msra.gmra.mxu0 %vm57_vm1, %v361_v51 }
 0x3fb   :  { %v428_v53 = vpop.f32.mrf.mxu0 }
 0x3fc   :  { %v429_v54 = vadd.f32 %v492_v52, %v428_v53 }
 0x3fd   :  { %v603_v55 = vpop.f32.mrf.mxu0 }
 0x3fe   :  { %435 = vst.msk [vmem:[#allocation2] sm:$0xff] %vm434_vm4, %v429_v54 }
 0x3ff   :  { %v431_v56 = vpop.f32.mrf.mxu0 }
 0x401   :  { %v604_v57 = vpop.f32.mrf.mxu0 }
 0x405   :  { %v454_v58 = vld [vmem:[#allocation2] sm:$0x3] }
 0x406   :  { %455 = vst [vmem:[%s773_s4] sm:$0x3] %v454_v58 }

</bundles_post_ra>
